<compile_context>
chip_gen: v7x
topology: tpu7x:2x2x1
jax: 0.10.0
libtpu: 0.0.40
codegen_flags: <defaults>
</compile_context>

<pallas_src>
import functools

import jax
import jax.numpy as jnp
from jax.experimental import pallas as pl
from jax.experimental.pallas import tpu as pltpu


def _round_up(x, m):
    return ((x + m - 1) // m) * m


def _apply_activation(y, activation):
    if activation == "tanh":
        return jnp.tanh(y)
    if activation == "relu":
        return jnp.maximum(y, 0.0)
    if activation == "leakyrelu":
        return jnp.where(y >= 0, y, 0.01 * y)  # nn.LeakyReLU default slope
    if activation == "sigmoid":
        return jax.nn.sigmoid(y)
    # 'identity' / 'none' / anything else -> no activation appended
    return y


# ---------------------------------------------------------------------------
# Kernels
# ---------------------------------------------------------------------------

def _linear_act_single_k_kernel(x_ref, w_ref, b_ref, o_ref, *, activation):
    """Whole reduction fits in one K tile: dot + bias + act straight to o_ref."""
    y = jnp.dot(x_ref[...], w_ref[...], preferred_element_type=jnp.float32)
    y = y + b_ref[...]                      # b_ref is (1, TN) -> broadcasts
    o_ref[...] = _apply_activation(y, activation).astype(o_ref.dtype)


def _linear_act_multi_k_kernel(x_ref, w_ref, b_ref, o_ref, *, activation):
    """K-tiled matmul accumulating directly into the resident f32 o_ref block."""
    k = pl.program_id(2)
    part = jnp.dot(x_ref[...], w_ref[...], preferred_element_type=jnp.float32)

    @pl.when(k == 0)
    def _():
        o_ref[...] = part

    @pl.when(k > 0)
    def _():
        o_ref[...] += part

    @pl.when(k == pl.num_programs(2) - 1)
    def _():
        o_ref[...] = _apply_activation(o_ref[...] + b_ref[...], activation)


def _mlp_kernel(*refs, activations):
    """Fused chain of Linear+activation layers; weights resident in VMEM."""
    x_ref = refs[0]
    o_ref = refs[-1]
    h = x_ref[...]
    for idx, act in enumerate(activations):
        w = refs[1 + 2 * idx][...]
        b = refs[2 + 2 * idx][...]
        h = jnp.dot(h.astype(w.dtype), w, preferred_element_type=jnp.float32)
        h = _apply_activation(h + b, act)
    o_ref[...] = h.astype(o_ref.dtype)


# ---------------------------------------------------------------------------
# Single-layer wrappers
# ---------------------------------------------------------------------------

def prepare_layer_params(weight, bias, *, activation="tanh", mxu_dtype=None,
                         max_tn=512, max_tk=1024):
    """Pad / transpose / cast the Linear parameters once (amortized across calls).

    weight: [out, in] (PyTorch nn.Linear layout), bias: [out].
    Returns a dict consumed by layer_forward_prepared.
    """
    out_c, in_c = weight.shape
    tn = min(max_tn, _round_up(out_c, 128))
    tk = min(max_tk, _round_up(in_c, 128))
    np_ = _round_up(out_c, tn)
    kp = _round_up(in_c, tk)

    wt = weight.T                              # (in, out): canonical MXU layout
    if wt.shape != (kp, np_):
        wt = jnp.pad(wt, ((0, kp - in_c), (0, np_ - out_c)))
    if mxu_dtype is not None:
        wt = wt.astype(mxu_dtype)

    b = bias if out_c == np_ else jnp.pad(bias, (0, np_ - out_c))
    b2 = b.reshape(1, np_).astype(jnp.float32)

    return dict(wt=wt, b2=b2, in_c=in_c, out_c=out_c, tn=tn, tk=tk,
                activation=activation, mxu_dtype=mxu_dtype)


def _vmem_limit_bytes(tm, tn, tk, in_itemsize, out_itemsize):
    # Double-buffered x / w / out tiles + bias + slack for compiler internals.
    need = 2 * (tm * tk + tk * tn) * in_itemsize
    need += 2 * tm * tn * max(out_itemsize, 4)
    need += 2 * 8 * tn * 4
    need += 4 << 20
    return int(min(max(need, 32 << 20), 48 << 20))


def layer_forward_prepared(x, prep, *, max_tm=512):
    """y = act(x @ W.T + b) using parameters prepared by prepare_layer_params."""
    activation = prep["activation"]
    mxu_dtype = prep["mxu_dtype"]
    in_c, out_c = prep["in_c"], prep["out_c"]
    wt, b2 = prep["wt"], prep["b2"]
    kp, np_ = wt.shape
    tn, tk = prep["tn"], prep["tk"]

    batch, in_c_x = x.shape
    assert in_c_x == in_c, (in_c_x, in_c)
    out_dtype = x.dtype

    tm = min(max_tm, _round_up(batch, 8))
    mp = _round_up(batch, tm)

    xp = x
    if xp.shape != (mp, kp):
        xp = jnp.pad(xp, ((0, mp - batch), (0, kp - in_c)))
    if mxu_dtype is not None:
        xp = xp.astype(mxu_dtype)

    k_steps = kp // tk
    in_itemsize = xp.dtype.itemsize
    out_itemsize = out_dtype.itemsize

    flops = 2 * batch * in_c * out_c
    transc = batch * out_c if activation in ("tanh", "sigmoid") else 0
    bytes_accessed = (xp.size * in_itemsize
                      + int(wt.size) * wt.dtype.itemsize
                      + int(b2.size) * 4
                      + mp * np_ * out_itemsize)
    cost = pl.CostEstimate(flops=int(flops), transcendentals=int(transc),
                           bytes_accessed=int(bytes_accessed))
    vmem_limit = _vmem_limit_bytes(tm, tn, tk, in_itemsize, out_itemsize)

    if k_steps == 1:
        # Fast path (the module's real shapes): no scratch, no pl.when.
        out = pl.pallas_call(
            functools.partial(_linear_act_single_k_kernel, activation=activation),
            out_shape=jax.ShapeDtypeStruct((mp, np_), out_dtype),
            grid_spec=pltpu.PrefetchScalarGridSpec(
                num_scalar_prefetch=0,
                grid=(mp // tm, np_ // tn),
                in_specs=[
                    pl.BlockSpec((tm, tk), lambda i, j: (i, 0)),
                    pl.BlockSpec((tk, tn), lambda i, j: (0, j)),
                    pl.BlockSpec((1, tn), lambda i, j: (0, j)),
                ],
                out_specs=pl.BlockSpec((tm, tn), lambda i, j: (i, j)),
            ),
            compiler_params=pltpu.CompilerParams(
                dimension_semantics=("parallel", "parallel"),
                vmem_limit_bytes=vmem_limit),
            cost_estimate=cost,
        )(xp, wt, b2)
    else:
        # K-tiled path: accumulate into the resident f32 output block
        # (no VMEM scratch, no finalize copy). Reduction axis is last.
        out = pl.pallas_call(
            functools.partial(_linear_act_multi_k_kernel, activation=activation),
            out_shape=jax.ShapeDtypeStruct((mp, np_), jnp.float32),
            grid_spec=pltpu.PrefetchScalarGridSpec(
                num_scalar_prefetch=0,
                grid=(mp // tm, np_ // tn, k_steps),
                in_specs=[
                    pl.BlockSpec((tm, tk), lambda i, j, k: (i, k)),
                    pl.BlockSpec((tk, tn), lambda i, j, k: (k, j)),
                    pl.BlockSpec((1, tn), lambda i, j, k: (0, j)),
                ],
                out_specs=pl.BlockSpec((tm, tn), lambda i, j, k: (i, j)),
            ),
            compiler_params=pltpu.CompilerParams(
                dimension_semantics=("parallel", "parallel", "arbitrary"),
                vmem_limit_bytes=vmem_limit),
            cost_estimate=cost,
        )(xp, wt, b2)

    if (mp, np_) != (batch, out_c):
        out = out[:batch, :out_c]
    if out.dtype != out_dtype:
        out = out.astype(out_dtype)
    return out


def layer_forward(x, weight, bias, *, activation="tanh", mxu_dtype=None,
                  max_tm=512, max_tn=512, max_tk=1024):
    """Convenience one-shot: y = act(x @ weight.T + bias).

    For repeated calls, use prepare_layer_params once + layer_forward_prepared
    so the weight pad/transpose/cast is not paid on every forward.
    """
    prep = prepare_layer_params(weight, bias, activation=activation,
                                mxu_dtype=mxu_dtype, max_tn=max_tn,
                                max_tk=max_tk)
    return layer_forward_prepared(x, prep, max_tm=max_tm)


# ---------------------------------------------------------------------------
# Fused multi-layer MLP (many Layer modules in one pallas_call)
# ---------------------------------------------------------------------------

def mlp_forward(x, layers, *, max_tm=512, mxu_dtype=None):
    """Fused MLP: `layers` is a list of (weight [out,in], bias [out], activation).

    All Linear+activation stages run in ONE pallas_call; weights stay resident
    in VMEM and the grid iterates over batch tiles only, so intermediate
    activations never round-trip through HBM.
    """
    batch, in_c = x.shape
    tm = min(max_tm, _round_up(batch, 8))
    mp = _round_up(batch, tm)

    xp = x if mp == batch else jnp.pad(x, ((0, mp - batch), (0, 0)))
    if mxu_dtype is not None:
        xp = xp.astype(mxu_dtype)

    operands = [xp]
    in_specs = [pl.BlockSpec((tm, in_c), lambda i: (i, 0))]
    activations = []
    flops = 0
    transc = 0
    vmem_need = 2 * tm * in_c * xp.dtype.itemsize
    cur = in_c
    for weight, bias, act in layers:
        out_c, w_in = weight.shape
        assert w_in == cur, (w_in, cur)
        wt = weight.T
        if mxu_dtype is not None:
            wt = wt.astype(mxu_dtype)
        b2 = bias.reshape(1, out_c).astype(jnp.float32)
        operands.append(wt)
        in_specs.append(pl.BlockSpec((cur, out_c), lambda i: (0, 0)))
        operands.append(b2)
        in_specs.append(pl.BlockSpec((1, out_c), lambda i: (0, 0)))
        activations.append(act)
        flops += 2 * batch * cur * out_c
        if act in ("tanh", "sigmoid"):
            transc += batch * out_c
        vmem_need += 2 * (int(wt.size) * wt.dtype.itemsize + int(b2.size) * 4)
        vmem_need += 2 * tm * out_c * 4      # intermediate-activation slack
        cur = out_c
    out_c = cur

    bytes_accessed = sum(int(a.size) * a.dtype.itemsize for a in operands)
    bytes_accessed += mp * out_c * x.dtype.itemsize
    cost = pl.CostEstimate(flops=int(flops), transcendentals=int(transc),
                           bytes_accessed=int(bytes_accessed))

    out = pl.pallas_call(
        functools.partial(_mlp_kernel, activations=tuple(activations)),
        out_shape=jax.ShapeDtypeStruct((mp, out_c), x.dtype),
        grid_spec=pltpu.PrefetchScalarGridSpec(
            num_scalar_prefetch=0,
            grid=(mp // tm,),
            in_specs=in_specs,
            out_specs=pl.BlockSpec((tm, out_c), lambda i: (i, 0)),
        ),
        compiler_params=pltpu.CompilerParams(
            dimension_semantics=("parallel",),
            vmem_limit_bytes=int(min(max(vmem_need + (4 << 20), 32 << 20),
                                     48 << 20))),
        cost_estimate=cost,
    )(*operands)

    return out[:batch] if mp != batch else out


# ---------------------------------------------------------------------------
# Parameter init (matches Layer.Initial_param) + pure-JAX reference
# ---------------------------------------------------------------------------

def init_layer_params(key, in_channels, out_channels, initialize="none"):
    if initialize == "zero":
        weight = jnp.zeros((out_channels, in_channels), jnp.float32)
    else:
        # xavier_normal_: std = sqrt(2 / (fan_in + fan_out))
        std = (2.0 / (in_channels + out_channels)) ** 0.5
        weight = std * jax.random.normal(
            key, (out_channels, in_channels), jnp.float32)
    bias = jnp.zeros((out_channels,), jnp.float32)
    return weight, bias


def _reference(x, weight, bias, activation="tanh"):
    return _apply_activation(
        x.astype(jnp.float32) @ weight.T.astype(jnp.float32) + bias, activation)


if __name__ == "__main__":
    key = jax.random.PRNGKey(0)
    ks = jax.random.split(key, 10)

    # --- Case 1: module's natural tiny shape (B=8, 32 -> 32, tanh) ----------
    B, Cin, Cout = 8, 32, 32
    x = jax.random.normal(ks[0], (B, Cin), jnp.float32)
    w, b = init_layer_params(ks[1], Cin, Cout, initialize="none")
    prep = prepare_layer_params(w, b, activation="tanh")   # pad/transpose once
    y = layer_forward_prepared(x, prep)
    jax.block_until_ready(y)
    assert y.shape == (B, Cout)
    assert jnp.allclose(y, _reference(x, w, b, "tanh"), atol=1e-5, rtol=1e-5)

    # --- Case 2: non-aligned shapes, multi-N-tile grid, sigmoid -------------
    B2, Cin2, Cout2 = 36, 200, 130
    x2 = jax.random.normal(ks[2], (B2, Cin2), jnp.float32)
    w2 = 0.05 * jax.random.normal(ks[3], (Cout2, Cin2), jnp.float32)
    b2 = 0.1 * jax.random.normal(ks[4], (Cout2,), jnp.float32)
    y2 = layer_forward(x2, w2, b2, activation="sigmoid", max_tn=128)
    jax.block_until_ready(y2)
    assert y2.shape == (B2, Cout2)
    assert jnp.allclose(y2, _reference(x2, w2, b2, "sigmoid"),
                        atol=1e-5, rtol=1e-5)

    # --- Case 3: force the K-tiled accumulation path (small K tiles) --------
    B3, Cin3, Cout3 = 16, 384, 96
    x3 = jax.random.normal(ks[5], (B3, Cin3), jnp.float32)
    w3 = 0.05 * jax.random.normal(ks[6], (Cout3, Cin3), jnp.float32)
    b3 = 0.1 * jax.random.normal(ks[7], (Cout3,), jnp.float32)
    y3 = layer_forward(x3, w3, b3, activation="leakyrelu", max_tk=128)
    jax.block_until_ready(y3)
    assert y3.shape == (B3, Cout3)
    assert jnp.allclose(y3, _reference(x3, w3, b3, "leakyrelu"),
                        atol=1e-5, rtol=1e-5)

    # --- Case 4: opt-in bf16 MXU operands (f32 accumulate + f32 epilogue) ---
    y2b = layer_forward(x2, w2, b2, activation="tanh", mxu_dtype=jnp.bfloat16)
    jax.block_until_ready(y2b)
    assert jnp.allclose(y2b, _reference(x2, w2, b2, "tanh"),
                        atol=5e-2, rtol=5e-2)
    # TODO(synk): fp8 weight path for v7x (its MXU has no int8) -- gated behind
    # a flag once numerics are validated for the target workload.

    # --- Case 5: fused 3-layer MLP in a single pallas_call ------------------
    dims = [(32, 64, "tanh"), (64, 48, "relu"), (48, 32, "identity")]
    kk = jax.random.split(ks[8], 2 * len(dims))
    mlp_layers = []
    for li, (ci, co, act) in enumerate(dims):
        wi, _ = init_layer_params(kk[2 * li], ci, co)
        bi = 0.1 * jax.random.normal(kk[2 * li + 1], (co,), jnp.float32)
        mlp_layers.append((wi, bi, act))
    xm = jax.random.normal(ks[9], (B, 32), jnp.float32)
    ym = mlp_forward(xm, mlp_layers)
    jax.block_until_ready(ym)
    ref = xm
    for wi, bi, act in mlp_layers:
        ref = _reference(ref, wi, bi, act)
    assert ym.shape == (B, 32)
    assert jnp.allclose(ym, ref, atol=1e-5, rtol=1e-5)

    print("KERNEL_OK")
</pallas_src>

<mosaic_0001>
module attributes {stable_mosaic.version = 11 : i64} {
  func.func @_linear_act_single_k_kernel(%arg0: i32, %arg1: i32, %arg2: memref<8x128xf32, #tpu.memory_space<vmem>>, %arg3: memref<128x128xf32, #tpu.memory_space<vmem>>, %arg4: memref<1x128xf32, #tpu.memory_space<vmem>>, %arg5: memref<8x128xf32, #tpu.memory_space<vmem>>) attributes {dimension_semantics = [#tpu.dimension_semantics<parallel>, #tpu.dimension_semantics<parallel>], iteration_bounds = array<i64: 1, 1>, scalar_prefetch = 0 : i64, scratch_operands = 0 : i64, tpu.core_type = #tpu.core_type<tc>, window_params = [{transform_indices = @transform_0, window_bounds = array<i64: 8, 128>}, {transform_indices = @transform_1, window_bounds = array<i64: 128, 128>}, {transform_indices = @transform_2, window_bounds = array<i64: 1, 128>}, {transform_indices = @transform_3, window_bounds = array<i64: 8, 128>}]} {
    %c0 = arith.constant 0 : index
    %c0_0 = arith.constant 0 : index
    %0 = vector.load %arg2[%c0, %c0_0] : memref<8x128xf32, #tpu.memory_space<vmem>>, vector<8x128xf32>
    %c0_1 = arith.constant 0 : index
    %c0_2 = arith.constant 0 : index
    %1 = vector.load %arg3[%c0_1, %c0_2] : memref<128x128xf32, #tpu.memory_space<vmem>>, vector<128x128xf32>
    %cst = arith.constant dense<0.000000e+00> : vector<8x128xf32>
    %2 = tpu.matmul %0, %1, %cst {dimension_numbers = #tpu.dot_dimension_numbers<[1], [0], [0], [1], [0, 0, 1, 1], [], []>} : vector<8x128xf32>, vector<128x128xf32>, vector<8x128xf32> -> vector<8x128xf32>
    %c0_3 = arith.constant 0 : index
    %c0_4 = arith.constant 0 : index
    %3 = vector.load %arg4[%c0_3, %c0_4] : memref<1x128xf32, #tpu.memory_space<vmem>>, vector<1x128xf32>
    %4 = vector.broadcast %3 : vector<1x128xf32> to vector<8x128xf32>
    %5 = arith.addf %2, %4 : vector<8x128xf32>
    %6 = math.tanh %5 : vector<8x128xf32>
    %c0_5 = arith.constant 0 : index
    %c0_6 = arith.constant 0 : index
    %7 = vector.load %arg5[%c0_5, %c0_6] : memref<8x128xf32, #tpu.memory_space<vmem>>, vector<8x128xf32>
    tpu.vector_store %arg5[%c0_5, %c0_6], %6 {strides = array<i32>} : memref<8x128xf32, #tpu.memory_space<vmem>>, vector<8x128xf32>,
    return
  }
  func.func @transform_0(%arg0: i32, %arg1: i32) -> (i32, i32) {
    %c0_i32 = arith.constant 0 : i32
    %c0_i32_0 = arith.constant 0 : i32
    return %arg0, %c0_i32 : i32, i32
  }
  func.func @transform_1(%arg0: i32, %arg1: i32) -> (i32, i32) {
    %c0_i32 = arith.constant 0 : i32
    %c0_i32_0 = arith.constant 0 : i32
    return %c0_i32, %arg1 : i32, i32
  }
  func.func @transform_2(%arg0: i32, %arg1: i32) -> (i32, i32) {
    %c0_i32 = arith.constant 0 : i32
    %c0_i32_0 = arith.constant 0 : i32
    return %c0_i32, %arg1 : i32, i32
  }
  func.func @transform_3(%arg0: i32, %arg1: i32) -> (i32, i32) {
    %c0_i32 = arith.constant 0 : i32
    return %arg0, %arg1 : i32, i32
  }
}

</mosaic_0001>

<bundles_post_ra>
// kernel: tpu_custom_call.1
= control target key start
LH: loop header
LB: loop body
LE: loop exit
PB: predicated region body
PF: predicated region fallthrough
CT: control target
= control target key end

     0   :  { %8 = vsyncpa [#allocation3], 0  ;;  %s386_s0 = inlined_call_operand.hbm [shape: f32[8,128], index: 0, kind: input, shape index: {}]   ;;  %s387_s1 = inlined_call_operand.hbm [shape: f32[128,128], index: 1, kind: input, shape index: {}]   ;;  %s388_s2 = inlined_call_operand.vmem [shape: f32[1,128], index: 2, kind: input, shape index: {}]   ;;  %s389_s3 = inlined_call_operand.hbm [shape: f32[8,128], index: 3, kind: output, shape index: {}]  }
   0x1   :  { %9 = vsyncpa [#allocation6], 0 }
   0x2   :  { %10 = vsyncpa [#allocation4], 0  ;;  %s312_s12 = smov [#allocation2]   ;;  %s313_s14 = smov [#allocation5]  }
   0x3   :  { %s17_s13 = sshll.u32 %s312_s12, 4  ;;  %s26_s15 = sshll.u32 %s313_s14, 4  ;;  %s18_s13 = int_to_ptr.vmem [resolvable:$true] %s17_s13  ;;  %s340_s15 = int_to_ptr.vmem [resolvable:$true] %s26_s15 }
   0x4   :  { %s240_s18 = scalar_lea.hbm %s386_s0, 128 }
   0x5   :  { %p241_p0 = scmp.ne.s32.totalorder %s386_s0, %s240_s18  ;;  %p244_p1 = scmp.lt.u32.totalorder %s240_s18, %s386_s0 }
   0x7   :  { %p246_p2 = pnand %p244_p1, %p241_p0 }
   0x9   :  { %249 = shalt.err (!%p246_p2)
}
   0xa   :  { %s250_s23 = scalar_lea.vmem %s18_s13, 128  ;;  %p255_p4 = scmp.lt.s32.totalorder %s18_s13, %s18_s13 }
   0xb   :  { %p251_p3 = scmp.ne.s32.totalorder %s18_s13, %s250_s23  ;;  %p256_p5 = scmp.lt.s32.totalorder %s250_s23, %s250_s23 }
   0xd   :  { %p257_p6 = por %p256_p5, %p255_p4 }
   0xf   :  { %p258_p7 = pnand %p257_p6, %p251_p3 }
  0x11   :  { %261 = shalt.err (!%p258_p7)
}
  0x12   :  { %20 = dma.hbm_to_vmem [thread:$0]  %s386_s0, 128, %s18_s13, [#allocation3]  }
  0x13   :  { %s262_s28 = scalar_lea.hbm %s387_s1, 2048 }
  0x14   :  { %p263_p8 = scmp.ne.s32.totalorder %s387_s1, %s262_s28  ;;  %p266_p9 = scmp.lt.u32.totalorder %s262_s28, %s387_s1 }
  0x16   :  { %p268_p10 = pnand %p266_p9, %p263_p8 }
  0x18   :  { %271 = shalt.err (!%p268_p10)
}
  0x19   :  { %s272_s6 = scalar_lea.vmem %s340_s15, 2048  ;;  %p277_p12 = scmp.lt.s32.totalorder %s340_s15, %s340_s15 }
  0x1a   :  { %p273_p11 = scmp.ne.s32.totalorder %s340_s15, %s272_s6  ;;  %p278_p13 = scmp.lt.s32.totalorder %s272_s6, %s272_s6 }
  0x1c   :  { %p279_p0 = por %p278_p13, %p277_p12 }
  0x1e   :  { %p280_p1 = pnand %p279_p0, %p273_p11 }
  0x20   :  { %283 = shalt.err (!%p280_p1)
}
  0x21   :  { %s314_s0 = smov 128   ;;  %s315_s7 = smov 8  }
  0x22   :  { %32 = dma.hbm_to_vmem [thread:$0]  %s387_s1, 2048, %s340_s15, [#allocation6], %s314_s0, %s314_s0, %s315_s7  }
  0x23   :  { %306 = dma.done.wait [#allocation3], 128  }
  0x24   :  { %307 = vsyncadd [#allocation3], 4294967168 }
  0x25   :  { %308 = dma.done.wait [#allocation6], 2048  }
  0x26   :  { %309 = vsyncadd [#allocation6], 4294965248  ;;  %v316_v0 = vmov 0.0|0.0   ;;  %vm317_vm0 = vmmov 0   ;;  %v318_v1 = vmov 0.0   ;;  %v42_v2 = vld [vmem:[#allocation5] sm:$0xff] }
  0x27   :  { %206 = vmatprep.subr.bf16.mxu0 %v316_v0  ;;  %203 = vmatprep.mubr.msk.f32.mxu0 %vm317_vm0, %v318_v1  ;;  %v43_v3 = vld [vmem:[#allocation5 + $0x8] sm:$0xff]  ;;  %v44_v4 = vld [vmem:[#allocation5 + $0x10] sm:$0xff]  ;;  %v45_v6 = vld [vmem:[#allocation5 + $0x18] sm:$0xff]  ;;  %s319_s11 = smov [#allocation7]  }
  0x28   :  { %v207_v5 = vpack.c.bf16 %v43_v3, %v42_v2  ;;  %v210_v7 = vpack.c.bf16 %v45_v6, %v44_v4  ;;  %v46_v8 = vld [vmem:[#allocation5 + $0x20] sm:$0xff]  ;;  %v47_v9 = vld [vmem:[#allocation5 + $0x28] sm:$0xff]  ;;  %v48_v11 = vld [vmem:[#allocation5 + $0x30] sm:$0xff]  ;;  %s143_s12 = sshll.u32 %s319_s11, 4  ;;  %s144_s12 = int_to_ptr.vmem [resolvable:$true] %s143_s12 }
  0x29   :  { %v213_v10 = vpack.c.bf16 %v47_v9, %v46_v8  ;;  %v49_v12 = vld [vmem:[#allocation5 + $0x38] sm:$0xff]  ;;  %v50_v14 = vld [vmem:[#allocation5 + $0x40] sm:$0xff]  ;;  %v51_v15 = vld [vmem:[#allocation5 + $0x48] sm:$0xff]  ;;  %s284_s13 = scalar_lea.vmem %s144_s12, 128  ;;  %p289_p3 = scmp.lt.s32.totalorder %s144_s12, %s144_s12 }
  0x2a   :  { %208 = vmatpush3.bf16.msra.mxu0 %v207_v5  ;;  %v216_v13 = vpack.c.bf16 %v49_v12, %v48_v11  ;;  %v219_v16 = vpack.c.bf16 %v51_v15, %v50_v14  ;;  %v52_v17 = vld [vmem:[#allocation5 + $0x50] sm:$0xff]  ;;  %v53_v18 = vld [vmem:[#allocation5 + $0x58] sm:$0xff]  ;;  %v54_v20 = vld [vmem:[#allocation5 + $0x60] sm:$0xff]  ;;  %p285_p2 = scmp.ne.s32.totalorder %s144_s12, %s284_s13  ;;  %p290_p4 = scmp.lt.s32.totalorder %s284_s13, %s284_s13 }
  0x2b   :  { %209 = vmatprep.subr.bf16.mxu0 %v316_v0  ;;  %v222_v19 = vpack.c.bf16 %v53_v18, %v52_v17  ;;  %v55_v21 = vld [vmem:[#allocation5 + $0x68] sm:$0xff]  ;;  %v56_v23 = vld [vmem:[#allocation5 + $0x70] sm:$0xff]  ;;  %v57_v24 = vld [vmem:[#allocation5 + $0x78] sm:$0xff] }
  0x2c   :  { %v225_v22 = vpack.c.bf16 %v55_v21, %v54_v20  ;;  %v228_v25 = vpack.c.bf16 %v57_v24, %v56_v23  ;;  %v41_v26 = vld [vmem:[#allocation2] sm:$0xff]  ;;  %p291_p5 = por %p290_p4, %p289_p3 }
  0x2d   :  { %v153_v27 = vld [vmem:[%s388_s2] ss:$0 sm:$0xff] }
  0x2e   :  { %211 = vmatpush3.bf16.msra.mxu0 %v210_v7  ;;  %p292_p6 = pnand %p291_p5, %p285_p2 }
  0x2f   :  { %212 = vmatprep.subr.bf16.mxu0 %v316_v0 }
  0x32   :  { %214 = vmatpush3.bf16.msra.mxu0 %v213_v10 }
  0x33   :  { %215 = vmatprep.subr.bf16.mxu0 %v316_v0 }
  0x36   :  { %217 = vmatpush3.bf16.msra.mxu0 %v216_v13 }
  0x37   :  { %218 = vmatprep.subr.bf16.mxu0 %v316_v0 }
  0x3a   :  { %220 = vmatpush3.bf16.msra.mxu0 %v219_v16 }
  0x3b   :  { %221 = vmatprep.subr.bf16.mxu0 %v316_v0 }
  0x3e   :  { %223 = vmatpush3.bf16.msra.mxu0 %v222_v19 }
  0x3f   :  { %224 = vmatprep.subr.bf16.mxu0 %v316_v0 }
  0x42   :  { %226 = vmatpush3.bf16.msra.mxu0 %v225_v22 }
  0x43   :  { %227 = vmatprep.subr.bf16.mxu0 %v316_v0 }
  0x46   :  { %229 = vmatpush3.bf16.msra.mxu0 %v228_v25 }
  0x49   :  { %204 = vmatmul.mubr.f32.vlgmr.msra.gmra.mrb[0].mxu0 %v41_v26 }
 0x11c   :  { %v131_v28 = vpop.f32.mrb[0].mxu0 }
 0x11d   :  { %v132_v29 = vadd.f32 %v153_v27, %v131_v28  ;;  %v205_v30 = vpop.f32.mrb[1].mxu0 }
 0x11f   :  { %238 = vtanh.f32 %v132_v29 }
 0x129   :  { %v239_v31 = vpop.eup %238 }
 0x12a   :  { %136 = vst [vmem:[#allocation7] sm:$0xff] %v239_v31 }
 0x12b   :  { %295 = shalt.err (!%p292_p6)
}
 0x12c   :  { %s296_s2 = scalar_lea.hbm %s389_s3, 128 }
 0x12d   :  { %p297_p7 = scmp.ne.s32.totalorder %s389_s3, %s296_s2  ;;  %p300_p8 = scmp.lt.u32.totalorder %s296_s2, %s389_s3 }
 0x12f   :  { %p302_p9 = pnand %p300_p8, %p297_p7 }
 0x131   :  { %305 = shalt.err (!%p302_p9)
}
 0x132   :  { %146 = dma.vmem_to_hbm [thread:$0]  %s144_s12, 128, %s389_s3, [#allocation4]  }
 0x133   :  { %310 = dma.done.wait [#allocation4], 128  }
 0x134   :  { %311 = vsyncadd [#allocation4], 4294967168 }
 0x135   :  { %150 = vsyncpa [#allocation3], 1 }
 0x136   :  { %151 = vsyncpa [#allocation6], 1 }
 0x137   :  { %152 = vsyncpa [#allocation4], 1 }

</bundles_post_ra>
